<compile_context>
chip_gen: v6e
topology: v6e:2x2x1
jax: 0.10.0
libtpu: 0.0.40
codegen_flags: <defaults>
</compile_context>

<pallas_src>
import numpy as np
import jax
import jax.numpy as jnp
from jax.experimental import pallas as pl
from jax.experimental.pallas import tpu as pltpu


def convert_int_to_list(value, len_list=2):
    if isinstance(value, (list, tuple)):
        assert len(value) == len_list
        return list(value)
    return [value] * len_list


def unfold_pallas(data, patch_size, padding=(0, 0)):
    """Pallas port of torch.nn.Unfold(kernel_size=patch, stride=patch, padding=padding)."""
    ph, pw = patch_size
    pad_h, pad_w = padding
    B, C, H, W = data.shape

    Hp, Wp = H + 2 * pad_h, W + 2 * pad_w
    assert Hp >= ph and Wp >= pw, "patch larger than (padded) input"
    GH = (Hp - ph) // ph + 1
    GW = (Wp - pw) // pw + 1
    Hc, Wc = GH * ph, GW * pw          # extent of the padded image actually used (floor L)
    L = GH * GW
    KK = ph * pw
    CKK = C * KK
    KKW = pw * GW                      # lanes of the gathered intermediate (== Wc)

    orig_dtype = data.dtype
    if jnp.issubdtype(orig_dtype, jnp.floating):
        cdtype = orig_dtype            # keep native dtype end-to-end (feedback: no f32 inflation)
        x_in = data
    else:
        # TODO(synk): integer inputs go through f32 selection matmuls (exact only for |x| < 2**24).
        cdtype = jnp.float32
        x_in = data.astype(jnp.float32)

    # Rows/cols of the ORIGINAL image that land inside the used (cropped, padded) region.
    h_valid = max(0, min(H, Hc - pad_h))
    w_valid = max(0, min(W, Wc - pad_w))
    if h_valid == 0 or w_valid == 0:   # degenerate: everything is padding
        return jnp.zeros((B, CKK, L), orig_dtype)

    # R folds the lane un-interleave (gw,pw)->(j,gw), the left/right zero padding and the
    # ragged column crop into one 0/1 matrix:  R[w, j*GW+gw] = 1  iff  gw*pw + j == w + pad_w.
    R_np = np.zeros((w_valid, KKW), np.float32)
    for j in range(pw):
        for gw in range(GW):
            w = gw * pw + j - pad_w
            if 0 <= w < w_valid:
                R_np[w, j * GW + gw] = 1.0
    # P is the tiny row permutation (j-major scratch row order -> torch (i, j) row order).
    P_np = np.zeros((KK, KK), np.float32)
    for i in range(ph):
        for j in range(pw):
            P_np[i * pw + j, j * ph + i] = 1.0
    R = jnp.asarray(R_np, cdtype)
    P = jnp.asarray(P_np, cdtype)

    # Top/bottom zero padding (and any unwritten rows) handled by zero-filling the scratch.
    needs_zero = (pad_h > 0) or (pad_h + h_valid < Hc)

    def kernel(x_ref, r_ref, p_ref, o_ref, g_scr, buf_scr):
        # x_ref : [H, W]      (one channel, one batch element)
        # r_ref : [w_valid, KKW]   p_ref: [KK, KK]
        # o_ref : [KK, L]     g_scr: [Hc, KKW]     buf_scr: [KK, L]
        xv = x_ref[:h_valid, :w_valid]
        # Single gather matmul, M = h_valid (whole image height), exact 0/1 selection.
        g = jnp.dot(xv, r_ref[...], preferred_element_type=jnp.float32).astype(cdtype)
        if needs_zero:
            g_scr[...] = jnp.zeros_like(g_scr)       # zero rows == top/bottom zero padding
        g_scr[pad_h:pad_h + h_valid, :] = g          # g_scr[hp, j*GW+gw] = padded_x[hp, gw*pw+j]
        # gh -> lanes, j -> rows.  Static Python loops: offsets stay compile-time constants
        # (no dynamic-lane-offset stores), c is already a grid axis, and each iteration is a
        # single slice + pw disjoint stores, so the unrolled size is only GH*pw statements.
        for gh in range(GH):
            gblk = g_scr[gh * ph:(gh + 1) * ph, :]   # [ph, KKW]
            for j in range(pw):
                buf_scr[j * ph:(j + 1) * ph, gh * GW:(gh + 1) * GW] = \
                    gblk[:, j * GW:(j + 1) * GW]
        # One lane-dense [KK, L] writeback; P reorders rows from (j, i) to torch's (i, j).
        o_ref[...] = jnp.dot(p_ref[...], buf_scr[...],
                             preferred_element_type=jnp.float32).astype(o_ref.dtype)

    itemsize = jnp.dtype(cdtype).itemsize
    est = itemsize * (2 * (H * W + KK * L)              # double-buffered in/out blocks
                      + 2 * (w_valid * KKW + KK * KK)   # constant selection matrices
                      + Hc * KKW + KK * L)              # VMEM scratch
    vmem_limit = int(min(64 * 2 ** 20, max(32 * 2 ** 20, 4 * est)))

    out4 = pl.pallas_call(
        kernel,
        # 4-D output keeps the per-channel block equal to the full last two dims
        # (no (8,128) divisibility issue even when ph*pw is not a multiple of 8);
        # the final reshape to [B, C*KK, L] is metadata-only.
        out_shape=jax.ShapeDtypeStruct((B, C, KK, L), cdtype),
        grid=(B, C),
        in_specs=[
            pl.BlockSpec((None, None, H, W), lambda b, c: (b, c, 0, 0)),  # one channel image
            pl.BlockSpec((w_valid, KKW), lambda b, c: (0, 0)),            # constant R
            pl.BlockSpec((KK, KK), lambda b, c: (0, 0)),                  # constant P
        ],
        out_specs=pl.BlockSpec((None, None, KK, L), lambda b, c: (b, c, 0, 0)),
        scratch_shapes=[
            pltpu.VMEM((Hc, KKW), cdtype),   # gathered / zero-padded intermediate
            pltpu.VMEM((KK, L), cdtype),     # j-major assembled output block
        ],
        compiler_params=pltpu.CompilerParams(
            dimension_semantics=("parallel", "parallel"),
            vmem_limit_bytes=vmem_limit,
        ),
    )(x_in, R, P)

    out = out4.reshape(B, CKK, L)
    if out.dtype != orig_dtype:
        out = out.astype(orig_dtype)
    return out


class Unfold:
    """JAX/Pallas port of the reference Unfold module (4-D tensors only)."""

    def __init__(self, patch_size, padding=0, img_channel=3):
        self.patch_size = convert_int_to_list(patch_size, len_list=2)
        self.padding = convert_int_to_list(padding, len_list=2)
        self.img_channel = img_channel  # kept for API parity; unused (as in the reference)

    def __call__(self, data):
        assert data.ndim == 4, "only 4D tensors are currently supported"
        return unfold_pallas(data, self.patch_size, self.padding)


def _unfold_ref(data, patch_size, padding):
    """Pure-JAX reference with identical semantics (reshape/transpose im2col)."""
    ph, pw = patch_size
    pad_h, pad_w = padding
    x = jnp.pad(data, ((0, 0), (0, 0), (pad_h, pad_h), (pad_w, pad_w)))
    B, C, Hp, Wp = x.shape
    GH = (Hp - ph) // ph + 1
    GW = (Wp - pw) // pw + 1
    x = x[:, :, : GH * ph, : GW * pw]
    y = x.reshape(B, C, GH, ph, GW, pw)
    y = jnp.transpose(y, (0, 1, 3, 5, 2, 4))  # [B, C, ph, pw, GH, GW]
    return y.reshape(B, C * ph * pw, GH * GW)


if __name__ == "__main__":
    key = jax.random.PRNGKey(0)
    k1, k2, k3 = jax.random.split(key, 3)

    B, C, H, W = 2, 3, 16, 16

    # Case 1: 4x4 patches, no padding -> [2, 48, 16]
    x1 = jax.random.normal(k1, (B, C, H, W), dtype=jnp.float32)
    unfold1 = Unfold(patch_size=4, padding=0, img_channel=C)
    y1 = unfold1(x1)
    jax.block_until_ready(y1)
    ref1 = _unfold_ref(x1, unfold1.patch_size, unfold1.padding)
    assert y1.shape == (B, C * 16, 16), y1.shape
    assert jnp.allclose(y1, ref1, atol=1e-5, rtol=1e-5)

    # Case 2: 3x3 patches with padding=1 -> 18x18 padded, 36 patches -> [2, 27, 36]
    x2 = jax.random.normal(k2, (B, C, H, W), dtype=jnp.float32)
    unfold2 = Unfold(patch_size=3, padding=1, img_channel=C)
    y2 = unfold2(x2)
    jax.block_until_ready(y2)
    ref2 = _unfold_ref(x2, unfold2.patch_size, unfold2.padding)
    assert y2.shape == (B, C * 9, 36), y2.shape
    assert jnp.allclose(y2, ref2, atol=1e-5, rtol=1e-5)

    # Case 3: native-dtype path (bf16 in -> bf16 out, no f32 round trip through HBM)
    x3 = jax.random.normal(k3, (B, C, H, W), dtype=jnp.bfloat16)
    y3 = unfold1(x3)
    jax.block_until_ready(y3)
    ref3 = _unfold_ref(x3, unfold1.patch_size, unfold1.padding)
    assert y3.dtype == jnp.bfloat16 and y3.shape == (B, C * 16, 16)
    assert jnp.array_equal(y3, ref3)  # pure copy -> bit exact

    print("KERNEL_OK")
</pallas_src>

<mosaic_0001>
module attributes {stable_mosaic.version = 11 : i64} {
  func.func @kernel(%arg0: i32, %arg1: i32, %arg2: memref<1x1x16x16xf32, #tpu.memory_space<vmem>>, %arg3: memref<16x16xf32, #tpu.memory_space<vmem>>, %arg4: memref<16x16xf32, #tpu.memory_space<vmem>>, %arg5: memref<1x1x16x16xf32, #tpu.memory_space<vmem>>, %arg6: memref<16x16xf32, #tpu.memory_space<vmem>>, %arg7: memref<16x16xf32, #tpu.memory_space<vmem>>) attributes {dimension_semantics = [#tpu.dimension_semantics<parallel>, #tpu.dimension_semantics<parallel>], iteration_bounds = array<i64: 2, 3>, scalar_prefetch = 0 : i64, scratch_operands = 2 : i64, tpu.core_type = #tpu.core_type<tc>, window_params = [{transform_indices = @transform_0, window_bounds = array<i64: 1, 1, 16, 16>}, {pipeline_mode = #tpu.pipeline_mode<synchronous>, transform_indices = @transform_1, window_bounds = array<i64: 16, 16>}, {pipeline_mode = #tpu.pipeline_mode<synchronous>, transform_indices = @transform_2, window_bounds = array<i64: 16, 16>}, {transform_indices = @transform_3, window_bounds = array<i64: 1, 1, 16, 16>}]} {
    %c0 = arith.constant 0 : index
    %c0_0 = arith.constant 0 : index
    %c0_1 = arith.constant 0 : index
    %c0_2 = arith.constant 0 : index
    %0 = vector.load %arg2[%c0, %c0_0, %c0_1, %c0_2] : memref<1x1x16x16xf32, #tpu.memory_space<vmem>>, vector<1x1x16x16xf32>
    %1 = vector.shape_cast %0 : vector<1x1x16x16xf32> to vector<16x16xf32>
    %c0_3 = arith.constant 0 : index
    %c0_4 = arith.constant 0 : index
    %2 = vector.load %arg3[%c0_3, %c0_4] : memref<16x16xf32, #tpu.memory_space<vmem>>, vector<16x16xf32>
    %cst = arith.constant dense<0.000000e+00> : vector<16x16xf32>
    %3 = tpu.matmul %1, %2, %cst {dimension_numbers = #tpu.dot_dimension_numbers<[1], [0], [0], [1], [0, 0, 1, 1], [], []>} : vector<16x16xf32>, vector<16x16xf32>, vector<16x16xf32> -> vector<16x16xf32>
    %c0_5 = arith.constant 0 : index
    %c0_6 = arith.constant 0 : index
    %4 = vector.load %arg6[%c0_5, %c0_6] : memref<16x16xf32, #tpu.memory_space<vmem>>, vector<16x16xf32>
    tpu.vector_store %arg6[%c0_5, %c0_6], %3 {strides = array<i32>} : memref<16x16xf32, #tpu.memory_space<vmem>>, vector<16x16xf32>,
    %c0_7 = arith.constant 0 : index
    %c0_8 = arith.constant 0 : index
    %5 = vector.load %arg6[%c0_7, %c0_8] : memref<16x16xf32, #tpu.memory_space<vmem>>, vector<4x16xf32>
    %6 = vector.extract_strided_slice %5 {offsets = [0, 0], sizes = [4, 4], strides = [1, 1]} : vector<4x16xf32> to vector<4x4xf32>
    %c0_9 = arith.constant 0 : index
    %c0_10 = arith.constant 0 : index
    %7 = vector.load %arg7[%c0_9, %c0_10] : memref<16x16xf32, #tpu.memory_space<vmem>>, vector<4x4xf32>
    tpu.vector_store %arg7[%c0_9, %c0_10], %6 {strides = array<i32>} : memref<16x16xf32, #tpu.memory_space<vmem>>, vector<4x4xf32>,
    %8 = vector.extract_strided_slice %5 {offsets = [0, 4], sizes = [4, 4], strides = [1, 1]} : vector<4x16xf32> to vector<4x4xf32>
    %c4 = arith.constant 4 : index
    %c0_11 = arith.constant 0 : index
    %9 = vector.load %arg7[%c4, %c0_11] : memref<16x16xf32, #tpu.memory_space<vmem>>, vector<4x4xf32>
    tpu.vector_store %arg7[%c4, %c0_11], %8 {strides = array<i32>} : memref<16x16xf32, #tpu.memory_space<vmem>>, vector<4x4xf32>,
    %10 = vector.extract_strided_slice %5 {offsets = [0, 8], sizes = [4, 4], strides = [1, 1]} : vector<4x16xf32> to vector<4x4xf32>
    %c8 = arith.constant 8 : index
    %c0_12 = arith.constant 0 : index
    %11 = vector.load %arg7[%c8, %c0_12] : memref<16x16xf32, #tpu.memory_space<vmem>>, vector<4x4xf32>
    tpu.vector_store %arg7[%c8, %c0_12], %10 {strides = array<i32>} : memref<16x16xf32, #tpu.memory_space<vmem>>, vector<4x4xf32>,
    %12 = vector.extract_strided_slice %5 {offsets = [0, 12], sizes = [4, 4], strides = [1, 1]} : vector<4x16xf32> to vector<4x4xf32>
    %c12 = arith.constant 12 : index
    %c0_13 = arith.constant 0 : index
    %13 = vector.load %arg7[%c12, %c0_13] : memref<16x16xf32, #tpu.memory_space<vmem>>, vector<4x4xf32>
    tpu.vector_store %arg7[%c12, %c0_13], %12 {strides = array<i32>} : memref<16x16xf32, #tpu.memory_space<vmem>>, vector<4x4xf32>,
    %c4_14 = arith.constant 4 : index
    %c0_15 = arith.constant 0 : index
    %14 = vector.load %arg6[%c4_14, %c0_15] : memref<16x16xf32, #tpu.memory_space<vmem>>, vector<4x16xf32>
    %15 = vector.extract_strided_slice %14 {offsets = [0, 0], sizes = [4, 4], strides = [1, 1]} : vector<4x16xf32> to vector<4x4xf32>
    %c0_16 = arith.constant 0 : index
    %c4_17 = arith.constant 4 : index
    %16 = vector.load %arg7[%c0_16, %c4_17] : memref<16x16xf32, #tpu.memory_space<vmem>>, vector<4x4xf32>
    tpu.vector_store %arg7[%c0_16, %c4_17], %15 {strides = array<i32>} : memref<16x16xf32, #tpu.memory_space<vmem>>, vector<4x4xf32>,
    %17 = vector.extract_strided_slice %14 {offsets = [0, 4], sizes = [4, 4], strides = [1, 1]} : vector<4x16xf32> to vector<4x4xf32>
    %c4_18 = arith.constant 4 : index
    %c4_19 = arith.constant 4 : index
    %18 = vector.load %arg7[%c4_18, %c4_19] : memref<16x16xf32, #tpu.memory_space<vmem>>, vector<4x4xf32>
    tpu.vector_store %arg7[%c4_18, %c4_19], %17 {strides = array<i32>} : memref<16x16xf32, #tpu.memory_space<vmem>>, vector<4x4xf32>,
    %19 = vector.extract_strided_slice %14 {offsets = [0, 8], sizes = [4, 4], strides = [1, 1]} : vector<4x16xf32> to vector<4x4xf32>
    %c8_20 = arith.constant 8 : index
    %c4_21 = arith.constant 4 : index
    %20 = vector.load %arg7[%c8_20, %c4_21] : memref<16x16xf32, #tpu.memory_space<vmem>>, vector<4x4xf32>
    tpu.vector_store %arg7[%c8_20, %c4_21], %19 {strides = array<i32>} : memref<16x16xf32, #tpu.memory_space<vmem>>, vector<4x4xf32>,
    %21 = vector.extract_strided_slice %14 {offsets = [0, 12], sizes = [4, 4], strides = [1, 1]} : vector<4x16xf32> to vector<4x4xf32>
    %c12_22 = arith.constant 12 : index
    %c4_23 = arith.constant 4 : index
    %22 = vector.load %arg7[%c12_22, %c4_23] : memref<16x16xf32, #tpu.memory_space<vmem>>, vector<4x4xf32>
    tpu.vector_store %arg7[%c12_22, %c4_23], %21 {strides = array<i32>} : memref<16x16xf32, #tpu.memory_space<vmem>>, vector<4x4xf32>,
    %c8_24 = arith.constant 8 : index
    %c0_25 = arith.constant 0 : index
    %23 = vector.load %arg6[%c8_24, %c0_25] : memref<16x16xf32, #tpu.memory_space<vmem>>, vector<4x16xf32>
    %24 = vector.extract_strided_slice %23 {offsets = [0, 0], sizes = [4, 4], strides = [1, 1]} : vector<4x16xf32> to vector<4x4xf32>
    %c0_26 = arith.constant 0 : index
    %c8_27 = arith.constant 8 : index
    %25 = vector.load %arg7[%c0_26, %c8_27] : memref<16x16xf32, #tpu.memory_space<vmem>>, vector<4x4xf32>
    tpu.vector_store %arg7[%c0_26, %c8_27], %24 {strides = array<i32>} : memref<16x16xf32, #tpu.memory_space<vmem>>, vector<4x4xf32>,
    %26 = vector.extract_strided_slice %23 {offsets = [0, 4], sizes = [4, 4], strides = [1, 1]} : vector<4x16xf32> to vector<4x4xf32>
    %c4_28 = arith.constant 4 : index
    %c8_29 = arith.constant 8 : index
    %27 = vector.load %arg7[%c4_28, %c8_29] : memref<16x16xf32, #tpu.memory_space<vmem>>, vector<4x4xf32>
    tpu.vector_store %arg7[%c4_28, %c8_29], %26 {strides = array<i32>} : memref<16x16xf32, #tpu.memory_space<vmem>>, vector<4x4xf32>,
    %28 = vector.extract_strided_slice %23 {offsets = [0, 8], sizes = [4, 4], strides = [1, 1]} : vector<4x16xf32> to vector<4x4xf32>
    %c8_30 = arith.constant 8 : index
    %c8_31 = arith.constant 8 : index
    %29 = vector.load %arg7[%c8_30, %c8_31] : memref<16x16xf32, #tpu.memory_space<vmem>>, vector<4x4xf32>
    tpu.vector_store %arg7[%c8_30, %c8_31], %28 {strides = array<i32>} : memref<16x16xf32, #tpu.memory_space<vmem>>, vector<4x4xf32>,
    %30 = vector.extract_strided_slice %23 {offsets = [0, 12], sizes = [4, 4], strides = [1, 1]} : vector<4x16xf32> to vector<4x4xf32>
    %c12_32 = arith.constant 12 : index
    %c8_33 = arith.constant 8 : index
    %31 = vector.load %arg7[%c12_32, %c8_33] : memref<16x16xf32, #tpu.memory_space<vmem>>, vector<4x4xf32>
    tpu.vector_store %arg7[%c12_32, %c8_33], %30 {strides = array<i32>} : memref<16x16xf32, #tpu.memory_space<vmem>>, vector<4x4xf32>,
    %c12_34 = arith.constant 12 : index
    %c0_35 = arith.constant 0 : index
    %32 = vector.load %arg6[%c12_34, %c0_35] : memref<16x16xf32, #tpu.memory_space<vmem>>, vector<4x16xf32>
    %33 = vector.extract_strided_slice %32 {offsets = [0, 0], sizes = [4, 4], strides = [1, 1]} : vector<4x16xf32> to vector<4x4xf32>
    %c0_36 = arith.constant 0 : index
    %c12_37 = arith.constant 12 : index
    %34 = vector.load %arg7[%c0_36, %c12_37] : memref<16x16xf32, #tpu.memory_space<vmem>>, vector<4x4xf32>
    tpu.vector_store %arg7[%c0_36, %c12_37], %33 {strides = array<i32>} : memref<16x16xf32, #tpu.memory_space<vmem>>, vector<4x4xf32>,
    %35 = vector.extract_strided_slice %32 {offsets = [0, 4], sizes = [4, 4], strides = [1, 1]} : vector<4x16xf32> to vector<4x4xf32>
    %c4_38 = arith.constant 4 : index
    %c12_39 = arith.constant 12 : index
    %36 = vector.load %arg7[%c4_38, %c12_39] : memref<16x16xf32, #tpu.memory_space<vmem>>, vector<4x4xf32>
    tpu.vector_store %arg7[%c4_38, %c12_39], %35 {strides = array<i32>} : memref<16x16xf32, #tpu.memory_space<vmem>>, vector<4x4xf32>,
    %37 = vector.extract_strided_slice %32 {offsets = [0, 8], sizes = [4, 4], strides = [1, 1]} : vector<4x16xf32> to vector<4x4xf32>
    %c8_40 = arith.constant 8 : index
    %c12_41 = arith.constant 12 : index
    %38 = vector.load %arg7[%c8_40, %c12_41] : memref<16x16xf32, #tpu.memory_space<vmem>>, vector<4x4xf32>
    tpu.vector_store %arg7[%c8_40, %c12_41], %37 {strides = array<i32>} : memref<16x16xf32, #tpu.memory_space<vmem>>, vector<4x4xf32>,
    %39 = vector.extract_strided_slice %32 {offsets = [0, 12], sizes = [4, 4], strides = [1, 1]} : vector<4x16xf32> to vector<4x4xf32>
    %c12_42 = arith.constant 12 : index
    %c12_43 = arith.constant 12 : index
    %40 = vector.load %arg7[%c12_42, %c12_43] : memref<16x16xf32, #tpu.memory_space<vmem>>, vector<4x4xf32>
    tpu.vector_store %arg7[%c12_42, %c12_43], %39 {strides = array<i32>} : memref<16x16xf32, #tpu.memory_space<vmem>>, vector<4x4xf32>,
    %c0_44 = arith.constant 0 : index
    %c0_45 = arith.constant 0 : index
    %41 = vector.load %arg4[%c0_44, %c0_45] : memref<16x16xf32, #tpu.memory_space<vmem>>, vector<16x16xf32>
    %c0_46 = arith.constant 0 : index
    %c0_47 = arith.constant 0 : index
    %42 = vector.load %arg7[%c0_46, %c0_47] : memref<16x16xf32, #tpu.memory_space<vmem>>, vector<16x16xf32>
    %cst_48 = arith.constant dense<0.000000e+00> : vector<16x16xf32>
    %43 = tpu.matmul %41, %42, %cst_48 {dimension_numbers = #tpu.dot_dimension_numbers<[1], [0], [0], [1], [0, 0, 1, 1], [], []>} : vector<16x16xf32>, vector<16x16xf32>, vector<16x16xf32> -> vector<16x16xf32>
    %c0_49 = arith.constant 0 : index
    %c0_50 = arith.constant 0 : index
    %c0_51 = arith.constant 0 : index
    %c0_52 = arith.constant 0 : index
    %44 = vector.load %arg5[%c0_49, %c0_50, %c0_51, %c0_52] : memref<1x1x16x16xf32, #tpu.memory_space<vmem>>, vector<1x1x16x16xf32>
    %45 = vector.shape_cast %44 : vector<1x1x16x16xf32> to vector<16x16xf32>
    %46 = vector.shape_cast %43 : vector<16x16xf32> to vector<1x1x16x16xf32>
    tpu.vector_store %arg5[%c0_49, %c0_50, %c0_51, %c0_52], %46 {strides = array<i32>} : memref<1x1x16x16xf32, #tpu.memory_space<vmem>>, vector<1x1x16x16xf32>,
    return
  }
  func.func @transform_0(%arg0: i32, %arg1: i32) -> (i32, i32, i32, i32) {
    %c0_i32 = arith.constant 0 : i32
    %c0_i32_0 = arith.constant 0 : i32
    %c0_i32_1 = arith.constant 0 : i32
    return %arg0, %arg1, %c0_i32, %c0_i32_0 : i32, i32, i32, i32
  }
  func.func @transform_1(%arg0: i32, %arg1: i32) -> (i32, i32) {
    %c0_i32 = arith.constant 0 : i32
    %c0_i32_0 = arith.constant 0 : i32
    %c0_i32_1 = arith.constant 0 : i32
    return %c0_i32, %c0_i32_0 : i32, i32
  }
  func.func @transform_2(%arg0: i32, %arg1: i32) -> (i32, i32) {
    %c0_i32 = arith.constant 0 : i32
    %c0_i32_0 = arith.constant 0 : i32
    %c0_i32_1 = arith.constant 0 : i32
    return %c0_i32, %c0_i32_0 : i32, i32
  }
  func.func @transform_3(%arg0: i32, %arg1: i32) -> (i32, i32, i32, i32) {
    %c0_i32 = arith.constant 0 : i32
    %c0_i32_0 = arith.constant 0 : i32
    %c0_i32_1 = arith.constant 0 : i32
    return %arg0, %arg1, %c0_i32, %c0_i32_0 : i32, i32, i32, i32
  }
}

</mosaic_0001>

<bundles_post_ra>
// kernel: tpu_custom_call.1
= control target key start
LH: loop header
LB: loop body
LE: loop exit
PB: predicated region body
PF: predicated region fallthrough
CT: control target
= control target key end

     0   :  { %s1216_s0 = inlined_call_operand.hbm [shape: f32[2,3,16,16], index: 0, kind: input, shape index: {}]   ;;  %s1217_s1 = inlined_call_operand.hbm [shape: f32[16,16], index: 1, kind: input, shape index: {}]   ;;  %s1218_s2 = inlined_call_operand.hbm [shape: f32[16,16], index: 2, kind: input, shape index: {}]   ;;  %s1219_s3 = inlined_call_operand.hbm [shape: f32[2,3,16,16], index: 3, kind: output, shape index: {}]  }
   0x1   :  { %1225 = sst [smem:[#allocation17_spill]] %s1217_s1 }
   0x2   :  { %1226 = sst [smem:[#allocation18_spill]] %s1218_s2 }
   0x3   :  { %8 = vsyncpa [#allocation5], 0 }
   0x4   :  { %10 = vsyncpa [#allocation5 + $0x1], 0 }
   0x5   :  { %11 = vsyncpa [#allocation8], 0 }
   0x6   :  { %12 = vsyncpa [#allocation6], 0 }
   0x7   :  { %14 = vsyncpa [#allocation6 + $0x1], 0  ;;  %s970_s12 = smov 0   ;;  %s972_s13 = smov 0  }
   0x8   :  { %s974_s14 = smov 0   ;;  %s976_s15 = smov 0  }
   0x9   :  { %s978_s16 = smov 0   ;;  %s980_s17 = smov 0  }
   0xa   :  { %s982_s18 = smov 0   ;;  %s984_s19 = smov 0  }
   0xb LB: > { %1227 = sst [smem:[#allocation14_spill]] %s907_s12  ;;  %s600_s20 = sadd.s32 4294967295, %s935_s19   ;;  %s935_s19 = sphi %s984_s19, %s20_s19   ;;  %s931_s18 = sphi %s982_s18, %s1252_s18   ;;  %s927_s17 = sphi %s980_s17, %s1251_s17   ;;  %s923_s16 = sphi %s978_s16, %s1250_s16   ;;  %s919_s15 = sphi %s976_s15, %s1249_s15   ;;  %s915_s14 = sphi %s974_s14, %s1248_s14   ;;  %s911_s13 = sphi %s972_s13, %s1247_s13   ;;  %s907_s12 = sphi %s970_s12, %s1246_s12  }
   0xc   : > { %s601_s21 = sadd.s32 4294967294, %s935_s19   ;;  %p54_p0 = scmp.ne.s32.totalorder %s911_s13, %s907_s12 }
   0xd   : > { %p1014_p1 = scmp.eq.s32.totalorder %s600_s20, 0  ;;  %p1018_p2 = scmp.eq.s32.totalorder %s600_s20, 5 }
   0xe   : > { %p128_p3 = scmp.eq.s32.totalorder %s601_s21, 5  ;;  %p602_p5 = scmp.ge.s32.totalorder %s935_s19, 1 }
   0xf   : > { %p1024_p4 = por %p1014_p1, %p54_p0  ;;  %p135_p7 = scmp.lt.s32.totalorder %s935_s19, 7 }
  0x10   : > { %p1029_p6 = por %p128_p3, %p54_p0  ;;  %s937_s27 = smov [#allocation7]  }
  0x11   : > { %p1034_p8 = pnand %p602_p5, %p135_p7  ;;  %s147_s28 = sshll.u32 %s937_s27, 4  ;;  %s148_s28 = int_to_ptr.vmem [resolvable:$true] %s147_s28 }
  0x12   : > { %s1231_s25 = scalar_select %p1029_p6, 1, 0 }
  0x13   : > { %p659_p9 = pneg %p1034_p8  ;;  %s938_s30 = smov [#allocation9]  }
  0x14   : > { %1232 = sst [smem:[#allocation15_spill]] %s1231_s25  ;;  %s160_s4 = sshll.u32 %s938_s30, 4  ;;  %s161_s4 = int_to_ptr.vmem [resolvable:$true] %s160_s4 }
  0x15   : > { %p1042_p10 = pnand %p659_p9, %p1014_p1  ;;  %s766_s5 = scalar_lea.vmem %s148_s28, 256 }
  0x16   : > { %p767_p12 = scmp.ne.s32.totalorder %s148_s28, %s766_s5  ;;  %p774_p3 = scmp.lt.s32.totalorder %s148_s28, %s148_s28 }
  0x17   : > { %p757_p11 = pneg %p1042_p10  ;;  %p775_p5 = scmp.lt.s32.totalorder %s766_s5, %s766_s5 }
  0x19   : > { %p769_p13 = pnand %p767_p12, %p757_p11  ;;  %p776_p7 = por %p775_p5, %p774_p3 }
  0x1b   : > { %p770_p0 = pneg %p769_p13 }
  0x1d   : > { %p777_p9 = pnand %p776_p7, %p770_p0 }
  0x1f   : > { %780 = shalt.err (!%p777_p9)
}
  0x20   : > { %s1220_s6 = smov 128   ;;  %s1221_s7 = smov 8  }
  0x21   : > { %s1235_s1 = sld [smem:[#allocation17_spill]]  ;;  %s792_s10 = scalar_lea.vmem %s161_s4, 256 }
  0x22   : > { %p793_p12 = scmp.ne.s32.totalorder %s161_s4, %s792_s10  ;;  %p800_p0 = scmp.lt.s32.totalorder %s161_s4, %s161_s4 }
  0x23   : > { %p801_p5 = scmp.lt.s32.totalorder %s792_s10, %s792_s10 }
  0x24   : > { %p795_p13 = pnand %p793_p12, %p757_p11 }
  0x25   : > { %p802_p7 = por %p801_p5, %p800_p0 }
  0x26   : > { %p796_p3 = pneg %p795_p13 }
  0x27   : > { %662 = dma.hbm_to_vmem [thread:$0]  (!%p1042_p10), %s1235_s1, 256, %s148_s28, [#allocation8], %s1220_s6, %s1220_s6, %s1221_s7  }
  0x28   : > { %p803_p9 = pnand %p802_p7, %p796_p3 }
  0x2a   : > { %806 = shalt.err (!%p803_p9)
}
  0x2b   : > { %s1236_s2 = sld [smem:[#allocation18_spill]]  ;;  %s29_s21 = sadd.s32 1, %s927_s17 }
  0x2c   : > { %s32_s27 = sadd.s32 1, %s931_s18  ;;  %p30_p11 = scmp.ge.s32.totalorder %s29_s21, 3 }
  0x2d   : > { %s41_s28 = sadd.s32 1, %s915_s14  ;;  %p48_p12 = scmp.ne.s32.totalorder %s915_s14, %s911_s13 }
  0x2e   : > { %p49_p13 = scmp.eq.s32.totalorder %s935_s19, 0  ;;  %s1254_s21 = smov (%p30_p11, %s29_s21), 0 }
  0x2f   : > { %1237 = sst [smem:[#allocation16_spill]] %s1254_s21  ;;  %s1256_s27 = smov (!%p30_p11, %s32_s27), %s931_s18 }
  0x30   : > { %s37_s29 = ssub.s32 %s927_s17, %s1254_s21  ;;  %p1081_p3 = por %p49_p13, %p48_p12 }
  0x31   : > { %665 = dma.hbm_to_vmem [thread:$0]  (!%p1042_p10), %s1236_s2, 256, %s161_s4, [#allocation8], %s1220_s6, %s1220_s6, %s1221_s7  }
  0x32   : > { %p34_p10 = scmp.ge.s32.totalorder %s1256_s27, 2  ;;  %p1087_p0 = por %p1018_p2, %p48_p12 }
  0x33   : > { %p676_p5 = scmp.lt.s32.totalorder %s935_s19, 6  ;;  %s174_s5 = sand.u32 1, %s915_s14  }
  0x34   : > { %s1258_s27 = smov (%p34_p10, %s1256_s27), 0  ;;  %s606_s8 = sshll.u32 %s174_s5, 4 }
  0x35   : > { %s36_s9 = ssub.s32 %s931_s18, %s1258_s27  ;;  %s607_s11 = sshll.u32 %s927_s17, 1 }
  0x36   : > { %s38_s10 = sor.u32 %s37_s29, %s36_s9  ;;  %s645_s20 = smul.u32 6, %s931_s18 }
  0x37   : > { %p39_p7 = scmp.eq.s32.totalorder %s38_s10, 0  ;;  %s178_s6 = scalar_lea.vmem [#allocation4], %s606_s8 }
  0x38   : > { %s187_s7 = sshll.u32 %s178_s6, 4  ;;  %p1101_p9 = pnand %p676_p5, %p1081_p3  ;;  %s188_s7 = int_to_ptr.vmem [resolvable:$true] %s187_s7 }
  0x39   : > { %s1106_s1 = scalar_select %p39_p7, %s915_s14, %s41_s28  }
  0x3a   : > { %s184_s2 = sadd.s32 %s645_s20, %s607_s11  ;;  %s175_s9 = scalar_lea.sflag [#allocation5], %s174_s5 }
  0x3b   : > { %s608_s21 = sshll.u32 %s184_s2, 7  ;;  %p809_p2 = pneg %p1101_p9 }
  0x3c   : > { %s186_s29 = scalar_lea.hbm %s1216_s0, %s608_s21  ;;  %s820_s8 = scalar_lea.vmem %s188_s7, 256 }
  0x3d   : > { %p821_p11 = scmp.ne.s32.totalorder %s188_s7, %s820_s8  ;;  %s941_s6 = smov [#allocation4]  }
  0x3e   : > { %s825_s30 = sshll.u32 %s941_s6, 4  ;;  %s826_s30 = int_to_ptr.vmem [resolvable:$false] %s825_s30 }
  0x3f   : > { %p823_p12 = pnand %p821_p11, %p809_p2  ;;  %s827_s10 = scalar_lea.vmem %s826_s30, 512 }
  0x40   : > { %p828_p3 = scmp.lt.s32.totalorder %s188_s7, %s826_s30  ;;  %p829_p10 = scmp.lt.s32.totalorder %s827_s10, %s820_s8 }
  0x41   : > { %p824_p13 = pneg %p823_p12 }
  0x42   : > { %p830_p5 = por %p829_p10, %p828_p3 }
  0x44   : > { %p831_p7 = pnand %p830_p5, %p824_p13 }
  0x46   : > { %834 = shalt.err (!%p831_p7)
}
  0x47   : > { %s1241_s2 = smov 8   ;;  %s1242_s12 = smov 128  }
  0x48   : > { %669 = dma.hbm_to_vmem [thread:$0]  (!%p1101_p9), %s186_s29, 256, %s188_s7, %s175_s9, %s1242_s12, %s1242_s12, %s1241_s2  }
  0x49   : > { %199 = sbr.rel (%p1034_p8) target bundleno = 643 (0x283), region = 32  ;;  %s1121_s25 = sand.u32 (!%p1034_p8), 1, %s911_s13  }
  0x4a   : > { %s610_s21 = sshll.u32 (!%p1034_p8), %s1121_s25, 4  ;;  %s202_s28 = scalar_lea.sflag (!%p1034_p8), [#allocation5], %s1121_s25 }
  0x4b   : > { %s205_s5 = scalar_lea.vmem (!%p1034_p8), [#allocation4], %s610_s21 }
  0x4e   : > { %894 = dma.done.wait (%p1024_p4), %s202_s28, 256  }
  0x4f   : > { %896 = vsyncadd (%p1024_p4), %s202_s28, 4294967040 }
  0x50   : > { %898 = dma.done.wait (%p1014_p1), [#allocation8], 512  }
  0x51   : > { %900 = vsyncadd (%p1014_p1), [#allocation8], 4294966784  ;;  %vm240_vm0 = vcmask 130048   ;;  %v239_v0 = vld [vmem:[#allocation7 + $0x8] sm:$0xff]  ;;  %v238_v1 = vld [vmem:[#allocation7] sm:$0xff]  ;;  %vm325_vm1 = vcmask 27648  }
  0x52   : > { %v236_v2 = vld [vmem:[%s205_s5] sm:$0xff]  ;;  %631 = vmatprep.subr.mxu0 %v239_v0  ;;  %v237_v3 = vld [vmem:[%s205_s5 + $0x8] sm:$0xff]  ;;  %s942_s22 = smov 8   ;;  %s943_s24 = smov 124   ;;  %vm345_vm2 = vcmask 60448   ;;  %vm361_vm3 = vcmask 93248  }
  0x53   : > { %635 = vmatprep.mubr.msk.f32.mxu0 %vm240_vm0, %v236_v2  ;;  %632 = vmatpush3.msra.mxu0 %v239_v0  ;;  %s944_s26 = smov 4   ;;  %s945_s7 = smov 120   ;;  %v388_v10 = vld [vmem:[#allocation9] sm:$0xff]  ;;  %vm377_vm4 = vcmask 126048   ;;  %v389_v25 = vld [vmem:[#allocation9 + $0x8] sm:$0xff] }
  0x54   : > { %633 = vmatprep.subr.mxu0 %v238_v1  ;;  %s946_s11 = smov 116   ;;  %642 = vmatprep.mubr.msk.f32.mxu1 %vm240_vm0, %v388_v10  ;;  %s947_s20 = smov 12  }
  0x55   : > { %634 = vmatpush3.msra.mxu0 %v238_v1  ;;  %s646_s23 = smul.u32 6, %s923_s16  ;;  %s619_s29 = sshll.u32 %s919_s15, 1 }
  0x56   : > { %636 = vmatmul.mubr.msk.f32.vlgmr.msra.gmra.mxu0 %vm240_vm0, %v237_v3  ;;  %s235_s8 = scalar_lea.vmem [#allocation10], %s610_s21  ;;  %s476_s15 = scalar_lea.sflag [#allocation6], %s1121_s25 }
  0x57   : > { %s488_s9 = sadd.s32 %s646_s23, %s619_s29  ;;  %s491_s6 = sshll.u32 %s235_s8, 4  ;;  %s1155_s6 = int_to_ptr.vmem [resolvable:$true] %s491_s6 }
  0x58   : > { %s620_s30 = sshll.u32 %s488_s9, 7  ;;  %s835_s16 = scalar_lea.vmem %s1155_s6, 256 }
  0x59   : > { %s1161_s12 = scalar_lea.hbm %s1219_s3, %s620_s30  ;;  %p836_p1 = scmp.ne.s32.totalorder %s1155_s6, %s835_s16 }
  0x5a   : > { %s948_s21 = smov [#allocation10]  }
  0x5b   : > { %p837_p4 = pnand %p836_p1, %p1087_p0  ;;  %s839_s28 = sshll.u32 %s948_s21, 4  ;;  %s840_s28 = int_to_ptr.vmem [resolvable:$false] %s839_s28 }
  0x5c   : > { %s841_s5 = scalar_lea.vmem %s840_s28, 512  ;;  %p842_p9 = scmp.lt.s32.totalorder %s1155_s6, %s840_s28 }
  0x5d   : > { %p838_p8 = pneg %p837_p4  ;;  %p843_p2 = scmp.lt.s32.totalorder %s841_s5, %s835_s16 }
  0x5f   : > { %p844_p11 = por %p843_p2, %p842_p9 }
  0x61   : > { %p845_p12 = pnand %p844_p11, %p838_p8 }
 0x116   : > { %v637_v4 = vpop.f32.mrf.mxu0 }
 0x117   : > { %323 = vst.msk [vmem:[#allocation2 + $0x8] sm:$0xff] %vm240_vm0, %v637_v4 }
 0x118   : > { %v313_v5 = vpop.f32.mrf.mxu0 }
 0x119   : > { %322 = vst.msk [vmem:[#allocation2] sm:$0xff] %vm240_vm0, %v313_v5 }
 0x11e   : > { %v356_v6 = vld [vmem:[#allocation2 + $0x8] sm:$0xf]  ;;  %v372_v8 = vld [vmem:[#allocation2 + $0xc] sm:$0xf] }
 0x11f   : > { %358 = vrot.lane.b32.xlu0 %v356_v6, %s942_s22  ;;  %368 = vrot.lane.b32.xlu1 %v356_v6, %s943_s24 }
 0x120   : > { %v324_v7 = vld [vmem:[#allocation2] sm:$0xf]  ;;  %v340_v9 = vld [vmem:[#allocation2 + $0x4] sm:$0xf] }
 0x121   : > { %326 = vst.msk [vmem:[#allocation3] sm:$0xf] %vm325_vm1, %v324_v7 }
 0x123   : > { %383 = vrot.lane.b32.xlu1 %v372_v8, %s944_s26  ;;  %332 = vrot.lane.b32.xlu0 %v324_v7, %s945_s7 }
 0x127   : > { %363 = vrot.lane.b32.xlu1 %v356_v6, %s944_s26  ;;  %336 = vrot.lane.b32.xlu0 %v324_v7, %s946_s11 }
 0x12b   : > { %348 = vrot.lane.b32.xlu1 %v340_v9, %s943_s24  ;;  %328 = vrot.lane.b32.xlu0 %v324_v7, %s943_s24 }
 0x12f   : > { %352 = vrot.lane.b32.xlu1 %v340_v9, %s945_s7  ;;  %342 = vrot.lane.b32.xlu0 %v340_v9, %s944_s26 }
 0x133   : > { %379 = vrot.lane.b32.xlu1 %v372_v8, %s942_s22  ;;  %374 = vrot.lane.b32.xlu0 %v372_v8, %s947_s20 }
 0x191   : > { %v359_v11 = vpop.permute.xlu0 %358  ;;  %v369_v12 = vpop.permute.xlu1 %368 }
 0x195   : > { %v384_v13 = vpop.permute.xlu1 %383  ;;  %v333_v14 = vpop.permute.xlu0 %332 }
 0x196   : > { %335 = vst.msk [vmem:[#allocation3 + $0x8] sm:$0xf] %vm325_vm1, %v333_v14 }
 0x199   : > { %v364_v15 = vpop.permute.xlu1 %363  ;;  %v337_v16 = vpop.permute.xlu0 %336 }
 0x19a   : > { %339 = vst.msk [vmem:[#allocation3 + $0xc] sm:$0xf] %vm325_vm1, %v337_v16 }
 0x19d   : > { %v349_v17 = vpop.permute.xlu1 %348  ;;  %v329_v18 = vpop.permute.xlu0 %328 }
 0x19e   : > { %351 = vst.msk [vmem:[#allocation3 + $0x8] sm:$0xf] %vm345_vm2, %v349_v17 }
 0x19f   : > { %331 = vst.msk [vmem:[#allocation3 + $0x4] sm:$0xf] %vm325_vm1, %v329_v18 }
 0x1a0   : > { %367 = vst.msk [vmem:[#allocation3 + $0x8] sm:$0xf] %vm361_vm3, %v356_v6 }
 0x1a1   : > { %347 = vst.msk [vmem:[#allocation3 + $0x4] sm:$0xf] %vm345_vm2, %v340_v9  ;;  %v353_v19 = vpop.permute.xlu1 %352  ;;  %v343_v20 = vpop.permute.xlu0 %342 }
 0x1a2   : > { %366 = vst.msk [vmem:[#allocation3 + $0x4] sm:$0xf] %vm361_vm3, %v364_v15 }
 0x1a3   : > { %386 = vst.msk [vmem:[#allocation3 + $0x8] sm:$0xf] %vm377_vm4, %v384_v13 }
 0x1a4   : > { %355 = vst.msk [vmem:[#allocation3 + $0xc] sm:$0xf] %vm345_vm2, %v353_v19  ;;  %346 = vst.msk [vmem:[#allocation3] sm:$0xf] %vm345_vm2, %v343_v20 }
 0x1a5   : > { %371 = vst.msk [vmem:[#allocation3 + $0xc] sm:$0xf] %vm361_vm3, %v369_v12  ;;  %362 = vst.msk [vmem:[#allocation3] sm:$0xf] %vm361_vm3, %v359_v11  ;;  %v380_v21 = vpop.permute.xlu1 %379  ;;  %v375_v22 = vpop.permute.xlu0 %374 }
 0x1a6   : > { %387 = vst.msk [vmem:[#allocation3 + $0xc] sm:$0xf] %vm377_vm4, %v372_v8  ;;  %382 = vst.msk [vmem:[#allocation3 + $0x4] sm:$0xf] %vm377_vm4, %v380_v21 }
 0x1a7   : > { %378 = vst.msk [vmem:[#allocation3] sm:$0xf] %vm377_vm4, %v375_v22 }
 0x1ad   : > { %v391_v23 = vld [vmem:[#allocation3 + $0x8] sm:$0xff] }
 0x1ae   : > { %638 = vmatprep.subr.mxu1 %v391_v23  ;;  %v390_v24 = vld [vmem:[#allocation3] sm:$0xff] }
 0x1af   : > { %639 = vmatpush3.msra.mxu1 %v391_v23 }
 0x1b0   : > { %640 = vmatprep.subr.mxu1 %v390_v24 }
 0x1b1   : > { %641 = vmatpush3.msra.mxu1 %v390_v24 }
 0x1b2   : > { %643 = vmatmul.mubr.msk.f32.vlgmr.msra.gmra.mxu1 %vm240_vm0, %v389_v25 }
 0x272   : > { %v644_v26 = vpop.f32.mrf.mxu1 }
 0x273   : > { %474 = vst.msk [vmem:[%s235_s8 + $0x8] sm:$0xff] %vm240_vm0, %v644_v26 }
 0x274   : > { %v464_v27 = vpop.f32.mrf.mxu1 }
 0x275   : > { %473 = vst.msk [vmem:[%s235_s8] sm:$0xff] %vm240_vm0, %v464_v27 }
 0x276   : > { %848 = shalt.err (!%p845_p12)
}
 0x277   : > { %s849_s24 = scalar_lea.hbm %s1161_s12, 256  ;;  %s853_s11 = scalar_lea.hbm %s1219_s3, 1536 }
 0x278   : > { %p850_p13 = scmp.ne.s32.totalorder %s1161_s12, %s849_s24  ;;  %p854_p5 = scmp.lt.s32.totalorder %s1161_s12, %s1219_s3 }
 0x279   : > { %p855_p7 = scmp.lt.s32.totalorder %s853_s11, %s849_s24 }
 0x27a   : > { %p851_p3 = pnand %p850_p13, %p1087_p0 }
 0x27b   : > { %p856_p1 = por %p855_p7, %p854_p5 }
 0x27c   : > { %p852_p10 = pneg %p851_p3 }
 0x27e   : > { %p857_p4 = pnand %p856_p1, %p852_p10 }
 0x280   : > { %860 = shalt.err (!%p857_p4)
}
 0x281   : > { %s949_s29 = smov 128  }
 0x282   : > { %657 = dma.vmem_to_hbm [thread:$0]  (%p1087_p0), %s1155_s6, 256, %s1161_s12, %s476_s15, %s949_s29, %s949_s29, %s942_s22  }
 0x283 PF: > { %s1243_s9 = sld [smem:[#allocation14_spill]]  ;;  %p679_p8 = scmp.ge.s32.totalorder %s935_s19, 2 }
 0x285   : > { %p671_p9 = pnand %p679_p8, %p1029_p6 }
 0x287   : > { %p672_p2 = pneg %p671_p9 }
 0x289   : > { %s506_s30 = sand.u32 1, %s1243_s9  }
 0x28a   : > { %s507_s10 = scalar_lea.sflag [#allocation6], %s506_s30 }
 0x28b   : > { %902 = dma.done.wait (%p672_p2), %s507_s10, 256  }
 0x28c   : > { %904 = vsyncadd (%p672_p2), %s507_s10, 4294967040  ;;  %s20_s19 = sadd.s32 1, %s935_s19   ;;  %s1245_s4 = sld [smem:[#allocation16_spill]] }
 0x28d   : > { %p17_p11 = scmp.ge.s32.totalorder %s20_s19, 8   ;;  %s1246_s12 = smov %s911_s13 }
 0x28e   : > { %s1247_s13 = smov %s915_s14  ;;  %s1248_s14 = smov %s1106_s1 }
 0x28f   : > { %s1249_s15 = smov %s927_s17  ;;  %s1250_s16 = smov %s931_s18 }
 0x290   : > { %s1252_s18 = smov %s1258_s27  ;;  %19 = sbr.rel (!%p17_p11) target bundleno = 11 (0xb), region = 85 }
 0x292   : > { %s1251_s17 = smov %s1245_s4 }
 0x295   :  { %512 = vsyncpa [#allocation5], 1 }
 0x296   :  { %514 = vsyncpa [#allocation5 + $0x1], 1 }
 0x297   :  { %515 = vsyncpa [#allocation8], 1 }
 0x298   :  { %516 = vsyncpa [#allocation6], 1 }
 0x299   :  { %518 = vsyncpa [#allocation6 + $0x1], 1 }

</bundles_post_ra>
